<compile_context>
chip_gen: v5e
topology: v5e:2x2
jax: 0.10.0
libtpu: 0.0.40
codegen_flags: <defaults>
</compile_context>

<pallas_src>
from functools import partial

import jax
import jax.numpy as jnp
from jax.experimental import pallas as pl
from jax.experimental.pallas import tpu as pltpu


# ---------------------------------------------------------------------------
# Generation-aware VMEM budget
# ---------------------------------------------------------------------------

def _default_vmem_limit():
    try:
        return int(pltpu.get_tpu_info().vmem_capacity_bytes * 3 // 4)
    except Exception:
        return 48 * 1024 * 1024   # safe on every generation (v7x has 64 MiB)


_VMEM_LIMIT = _default_vmem_limit()


# ---------------------------------------------------------------------------
# Optional single-buffered resident blocks (pipeline_mode=pl.Buffered(1))
# ---------------------------------------------------------------------------

_SINGLE_BUFFER_OK = None


def _single_buffer_supported():
    """Probe once whether BlockSpec(pipeline_mode=pl.Buffered(1)) lowers on this
    jax/Mosaic version; fall back silently to default double-buffering if not."""
    global _SINGLE_BUFFER_OK
    if _SINGLE_BUFFER_OK is not None:
        return _SINGLE_BUFFER_OK

    def _probe_kernel(x_ref, o_ref):
        o_ref[...] = x_ref[...] + 1.0

    try:
        spec = pl.BlockSpec((8, 128), lambda i: (0, 0),
                            pipeline_mode=pl.Buffered(1))
        out = pl.pallas_call(
            _probe_kernel,
            out_shape=jax.ShapeDtypeStruct((8, 128), jnp.float32),
            grid=(1,),
            in_specs=[spec],
            out_specs=pl.BlockSpec((8, 128), lambda i: (0, 0)),
        )(jnp.zeros((8, 128), jnp.float32))
        jax.block_until_ready(out)
        _SINGLE_BUFFER_OK = True
    except Exception:
        _SINGLE_BUFFER_OK = False
    return _SINGLE_BUFFER_OK


def _resident_spec(block_shape, index_map):
    """Spec for a block whose index never changes: single-buffer it when possible
    (halves its VMEM footprint; matters most for large resident weights on v7x)."""
    if _single_buffer_supported():
        return pl.BlockSpec(block_shape, index_map, pipeline_mode=pl.Buffered(1))
    return pl.BlockSpec(block_shape, index_map)


# ---------------------------------------------------------------------------
# Linear kernels (M-tiled, resident or N-tiled weight, bf16 MXU / f32 accumulate)
# ---------------------------------------------------------------------------

def _linear_kernel(x_ref, w_ref, o_ref):
    o_ref[...] = jnp.dot(x_ref[...].astype(jnp.bfloat16),
                         w_ref[...].astype(jnp.bfloat16),
                         preferred_element_type=jnp.float32).astype(o_ref.dtype)


def _linear_bias_kernel(x_ref, w_ref, b_ref, o_ref):
    acc = jnp.dot(x_ref[...].astype(jnp.bfloat16),
                  w_ref[...].astype(jnp.bfloat16),
                  preferred_element_type=jnp.float32)
    o_ref[...] = (acc + b_ref[...].astype(jnp.float32)).astype(o_ref.dtype)


def pallas_linear(x2d, w, b=None, *, tm=512, out_dtype=jnp.bfloat16):
    """x2d: (M, K) @ w: (K, Nout) [+ b] -> (M, Nout).

    Grid = (Nout tiles, M tiles).  The weight tile stays resident across the
    inner (parallel) M axis; it is only N-tiled when a fully resident tile would
    not fit the VMEM budget (large C on v7x)."""
    M, K = x2d.shape
    Nout = w.shape[1]

    tm = min(tm, M)
    if M % 16 == 0 and M // tm < 2:
        tm = M // 2                     # keep >= 2 M tiles so both v7x TCs get work
    n_m = pl.cdiv(M, tm)

    # N-tile the weight only if a fully resident (bf16) tile would not fit.
    tn = Nout
    budget = max(_VMEM_LIMIT // 4, 1 << 20)
    while K * tn * 2 > budget and tn % 256 == 0:
        tn //= 2
    n_n = pl.cdiv(Nout, tn)

    grid = (n_n, n_m)
    x_spec = pl.BlockSpec((tm, K), lambda j, i: (i, 0))
    o_spec = pl.BlockSpec((tm, tn), lambda j, i: (i, j))
    if n_n == 1:
        w_spec = _resident_spec((K, tn), lambda j, i: (0, 0))
    else:
        w_spec = pl.BlockSpec((K, tn), lambda j, i: (0, j))

    cost = pl.CostEstimate(
        flops=2 * M * K * Nout, transcendentals=0,
        bytes_accessed=(x2d.dtype.itemsize * M * K
                        + w.dtype.itemsize * K * Nout
                        + jnp.dtype(out_dtype).itemsize * M * Nout))
    cparams = pltpu.CompilerParams(dimension_semantics=("parallel", "parallel"),
                                   vmem_limit_bytes=_VMEM_LIMIT)
    out_shape = jax.ShapeDtypeStruct((M, Nout), out_dtype)

    if b is None:
        return pl.pallas_call(_linear_kernel, out_shape=out_shape, grid=grid,
                              in_specs=[x_spec, w_spec], out_specs=o_spec,
                              compiler_params=cparams, cost_estimate=cost)(x2d, w)

    if n_n == 1:
        b_spec = _resident_spec((1, tn), lambda j, i: (0, 0))
    else:
        b_spec = pl.BlockSpec((1, tn), lambda j, i: (0, j))
    return pl.pallas_call(_linear_bias_kernel, out_shape=out_shape, grid=grid,
                          in_specs=[x_spec, w_spec, b_spec], out_specs=o_spec,
                          compiler_params=cparams, cost_estimate=cost)(
                              x2d, w, b.reshape(1, Nout))


# ---------------------------------------------------------------------------
# Attention kernel: `tb` batch elements (all heads) per grid step
# ---------------------------------------------------------------------------

def _attn_kernel(q_ref, k_ref, v_ref, kxc_ref, o_ref, *, tb, seq, num_heads, scale):
    """q/k/v/kxc blocks are (tb*seq, C) token-major column slabs (bf16).
    Per head: fused scale * (q @ (k + k_xc)^T), f32 softmax, p @ v, and the
    result is written straight into the head's hd-wide columns of the lane-dense
    (tb*seq, C) output block."""
    C = q_ref.shape[-1]
    hd = C // num_heads

    for h in range(num_heads):                           # static unroll over heads
        lo = h * hd
        hi = lo + hd
        # Elementwise math in f32 (v5e has no bf16 VPU); MXU operands in bf16.
        k_h = (k_ref[:, lo:hi].astype(jnp.float32)
               + kxc_ref[:, lo:hi].astype(jnp.float32)).astype(jnp.bfloat16)
        q_h = q_ref[:, lo:hi].astype(jnp.bfloat16)
        v_h = v_ref[:, lo:hi].astype(jnp.bfloat16)

        q_h = q_h.reshape(tb, seq, hd)
        k_h = k_h.reshape(tb, seq, hd)
        v_h = v_h.reshape(tb, seq, hd)

        # Fused q @ (k + k_xc)^T per batch element, no materialized transpose.
        s = jax.lax.dot_general(q_h, k_h, (((2,), (2,)), ((0,), (0,))),
                                preferred_element_type=jnp.float32)   # (tb, seq, seq)
        s = s * scale
        s = s - jnp.max(s, axis=-1, keepdims=True)
        p = jnp.exp(s)
        p = p * pl.reciprocal(jnp.sum(p, axis=-1, keepdims=True), approx=True)

        o_h = jax.lax.dot_general(p.astype(jnp.bfloat16), v_h,
                                  (((2,), (1,)), ((0,), (0,))),
                                  preferred_element_type=jnp.float32)  # (tb, seq, hd)
        o_ref[:, lo:hi] = o_h.reshape(tb * seq, hd).astype(o_ref.dtype)

    # TODO(synk): a head-batched single dot_general (einshape to (tb*H, seq, hd))
    # would use more of the 256-wide MXU; kept per-head to avoid in-kernel
    # middle-axis transposes at small, non-128-aligned head dims.
    # TODO(synk): add a KV-tiled (flash-style online-softmax) path for long
    # sequences so VMEM use is O(seq * tk) instead of O(seq^2) (v7x 64 MiB).


def pallas_attention(qkv, kxc, B, N, C, num_heads, scale, *, out_dtype=jnp.bfloat16):
    """qkv: (B*N, 3C) token-major bf16, kxc: (B*N, C) bf16 -> (B*N, C) bf16."""
    hd = C // num_heads

    # Batch elements per grid step: amortize the ~0.35us/step overhead and make
    # the DMAs larger, but keep grid extent >= 2 so both v7x TCs get work.
    if N % 8 == 0:
        tb = 1
        while (tb * 2 <= B and B % (tb * 2) == 0
               and B // (tb * 2) >= 2 and tb * 2 * N <= 1024):
            tb *= 2
    else:
        # (8,128) legality needs tb*N % 8 == 0 or tb*N == B*N.
        tb = B
    grid = (B // tb,)
    rows = tb * N

    if C % 128 == 0:
        # Read q/k/v directly out of the packed (B*N, 3C) buffer via column block
        # indices -- no HBM split / transpose.
        q_in, k_in, v_in = qkv, qkv, qkv
        q_spec = pl.BlockSpec((rows, C), lambda b: (b, 0))   # cols [0,  C)
        k_spec = pl.BlockSpec((rows, C), lambda b: (b, 1))   # cols [C, 2C)
        v_spec = pl.BlockSpec((rows, C), lambda b: (b, 2))   # cols [2C,3C)
    else:
        # Lane-misaligned C: fall back to contiguous splits (one HBM copy each).
        q_in, k_in, v_in = qkv[:, :C], qkv[:, C:2 * C], qkv[:, 2 * C:]
        q_spec = k_spec = v_spec = pl.BlockSpec((rows, C), lambda b: (b, 0))

    kxc_spec = pl.BlockSpec((rows, C), lambda b: (b, 0))
    out_spec = pl.BlockSpec((rows, C), lambda b: (b, 0))

    cost = pl.CostEstimate(
        flops=4 * B * num_heads * N * N * hd + 6 * B * num_heads * N * N,
        transcendentals=B * num_heads * N * N,
        bytes_accessed=2 * 5 * B * N * C)     # bf16 in / bf16 out

    return pl.pallas_call(
        partial(_attn_kernel, tb=tb, seq=N, num_heads=num_heads, scale=scale),
        out_shape=jax.ShapeDtypeStruct((B * N, C), out_dtype),
        grid=grid,
        in_specs=[q_spec, k_spec, v_spec, kxc_spec],
        out_specs=out_spec,
        compiler_params=pltpu.CompilerParams(
            dimension_semantics=("parallel",), vmem_limit_bytes=_VMEM_LIMIT),
        cost_estimate=cost,
    )(q_in, k_in, v_in, kxc)


# ---------------------------------------------------------------------------
# Module forward (all heavy math in Pallas; only free reshapes / dtype casts outside)
# ---------------------------------------------------------------------------

def init_params(key, dim, num_heads):
    """Synthetic parameters.  Weights are stored in (in, out) layout (transpose of
    PyTorch nn.Linear) so no HBM transpose is needed at call time.  qkv / qkv_xc
    have no bias (qkv_bias=False); proj has bias."""
    k1, k2, k3, k4 = jax.random.split(key, 4)
    std = 0.02
    return {
        "qkv_w": std * jax.random.normal(k1, (dim, 3 * dim), jnp.float32),
        "qkv_xc_w": std * jax.random.normal(k2, (dim, dim), jnp.float32),
        "proj_w": std * jax.random.normal(k3, (dim, dim), jnp.float32),
        "proj_b": std * jax.random.normal(k4, (dim,), jnp.float32),
        "num_heads": num_heads,
        "scale": (dim // num_heads) ** (-0.5),
    }


def attention_xxc_forward(params, x, xc):
    """Pallas implementation of Attention_xxc.forward (comb=False, xc given, N != 17)."""
    B, N, C = x.shape
    H = params["num_heads"]
    scale = params["scale"]

    x2d = x.reshape(B * N, C)       # contiguous reshape, no copy
    xc2d = xc.reshape(B * N, C)

    # bf16 weights for the MXU (f32 master copies stay in params).
    w_qkv = params["qkv_w"].astype(jnp.bfloat16)
    w_xc = params["qkv_xc_w"].astype(jnp.bfloat16)
    w_proj = params["proj_w"].astype(jnp.bfloat16)

    qkv = pallas_linear(x2d, w_qkv)      # (B*N, 3C) bf16, no bias
    kxc = pallas_linear(xc2d, w_xc)      # (B*N, C)  bf16, no bias
    # TODO(synk): the kxc HBM roundtrip could be folded into the attention kernel
    # (resident (C,C) weight, per-block (tb*N,C)@(C,C)) on bandwidth-bound parts.

    # Attention over all heads; output is token-major (B*N, C) bf16, consumed
    # directly by proj (no HBM head transpose anywhere).
    out = pallas_attention(qkv, kxc, B, N, C, H, scale)

    # proj (+ bias), f32 accumulate, f32 output; attn_drop / proj_drop are p=0.0.
    out = pallas_linear(out, w_proj, params["proj_b"], out_dtype=jnp.float32)
    return out.reshape(B, N, C)

# TODO(synk): the q.shape[-2] == 17 bonechain in-place score-averaging branch is
# not exercised here (N != 17, xc path); it would be a small scalar update on the
# (N, N) score tile before softmax.


# ---------------------------------------------------------------------------
# Pure-JAX f32 reference for verification
# ---------------------------------------------------------------------------

def reference_forward(params, x, xc):
    B, N, C = x.shape
    H = params["num_heads"]
    hd = C // H
    scale = params["scale"]
    qkv = (x @ params["qkv_w"]).reshape(B, N, 3, H, hd).transpose(2, 0, 3, 1, 4)
    q, k, v = qkv[0], qkv[1], qkv[2]
    kxc = (xc @ params["qkv_xc_w"]).reshape(B, N, 1, H, hd).transpose(2, 0, 3, 1, 4)[0]
    attn = jnp.einsum("bhnd,bhmd->bhnm", q, k) * scale
    attn = attn + jnp.einsum("bhnd,bhmd->bhnm", q, kxc) * scale
    attn = jax.nn.softmax(attn, axis=-1)
    out = jnp.einsum("bhnm,bhmd->bhnd", attn, v)
    out = out.transpose(0, 2, 1, 3).reshape(B, N, C)
    return out @ params["proj_w"] + params["proj_b"]


if __name__ == "__main__":
    # Small but lane-aligned shapes: C multiple of 128 keeps every BlockSpec
    # (8,128)-legal and exercises the transpose-free packed-qkv column indexing;
    # B=4 exercises tb=2 batching with a grid of 2 (both v7x TensorCores busy).
    B, N, C, H = 4, 8, 128, 8

    key = jax.random.PRNGKey(0)
    kp, kx, kxc_key = jax.random.split(key, 3)
    params = init_params(kp, C, H)
    x = jax.random.normal(kx, (B, N, C), jnp.float32)
    xc = jax.random.normal(kxc_key, (B, N, C), jnp.float32)

    out = attention_xxc_forward(params, x, xc)
    out = jax.block_until_ready(out)

    ref = reference_forward(params, x, xc)
    assert out.shape == (B, N, C)
    err = jnp.max(jnp.abs(out - ref))
    # bf16 MXU operands / bf16 intermediates with f32 accumulation: ~1e-3 level.
    assert jnp.allclose(out, ref, atol=1e-2, rtol=1e-2), f"max abs err {err}"

    print("KERNEL_OK")
</pallas_src>

<mosaic_0001>
module attributes {stable_mosaic.version = 11 : i64} {
  func.func @_probe_kernel(%arg0: i32, %arg1: memref<8x128xf32, #tpu.memory_space<vmem>>, %arg2: memref<8x128xf32, #tpu.memory_space<vmem>>) attributes {dimension_semantics = [#tpu.dimension_semantics<arbitrary>], iteration_bounds = array<i64: 1>, scalar_prefetch = 0 : i64, scratch_operands = 0 : i64, tpu.core_type = #tpu.core_type<tc>, window_params = [{pipeline_mode = #tpu.pipeline_mode<synchronous>, transform_indices = @transform_0, window_bounds = array<i64: 8, 128>}, {pipeline_mode = #tpu.pipeline_mode<synchronous>, transform_indices = @transform_1, window_bounds = array<i64: 8, 128>}]} {
    %c0 = arith.constant 0 : index
    %c0_0 = arith.constant 0 : index
    %0 = vector.load %arg1[%c0, %c0_0] : memref<8x128xf32, #tpu.memory_space<vmem>>, vector<8x128xf32>
    %cst = arith.constant 1.000000e+00 : f32
    %1 = vector.broadcast %cst : f32 to vector<8x128xf32>
    %2 = arith.addf %0, %1 : vector<8x128xf32>
    %c0_1 = arith.constant 0 : index
    %c0_2 = arith.constant 0 : index
    %3 = vector.load %arg2[%c0_1, %c0_2] : memref<8x128xf32, #tpu.memory_space<vmem>>, vector<8x128xf32>
    tpu.vector_store %arg2[%c0_1, %c0_2], %2 {strides = array<i32>} : memref<8x128xf32, #tpu.memory_space<vmem>>, vector<8x128xf32>,
    return
  }
  func.func @transform_0(%arg0: i32) -> (i32, i32) {
    %c0_i32 = arith.constant 0 : i32
    %c0_i32_0 = arith.constant 0 : i32
    %c0_i32_1 = arith.constant 0 : i32
    return %c0_i32, %c0_i32_0 : i32, i32
  }
  func.func @transform_1(%arg0: i32) -> (i32, i32) {
    %c0_i32 = arith.constant 0 : i32
    %c0_i32_0 = arith.constant 0 : i32
    %c0_i32_1 = arith.constant 0 : i32
    return %c0_i32, %c0_i32_0 : i32, i32
  }
}

module attributes {stable_mosaic.version = 11 : i64} {
  func.func @_linear_kernel(%arg0: i32, %arg1: i32, %arg2: memref<16x128xf32, #tpu.memory_space<vmem>>, %arg3: memref<128x384xbf16, #tpu.memory_space<vmem>>, %arg4: memref<16x384xbf16, #tpu.memory_space<vmem>>) attributes {dimension_semantics = [#tpu.dimension_semantics<parallel>, #tpu.dimension_semantics<parallel>], iteration_bounds = array<i64: 1, 2>, scalar_prefetch = 0 : i64, scratch_operands = 0 : i64, tpu.core_type = #tpu.core_type<tc>, window_params = [{transform_indices = @transform_0, window_bounds = array<i64: 16, 128>}, {pipeline_mode = #tpu.pipeline_mode<synchronous>, transform_indices = @transform_1, window_bounds = array<i64: 128, 384>}, {transform_indices = @transform_2, window_bounds = array<i64: 16, 384>}]} {
    %c0 = arith.constant 0 : index
    %c0_0 = arith.constant 0 : index
    %0 = vector.load %arg2[%c0, %c0_0] : memref<16x128xf32, #tpu.memory_space<vmem>>, vector<16x128xf32>
    %1 = arith.truncf %0 : vector<16x128xf32> to vector<16x128xbf16>
    %c0_1 = arith.constant 0 : index
    %c0_2 = arith.constant 0 : index
    %2 = vector.load %arg3[%c0_1, %c0_2] : memref<128x384xbf16, #tpu.memory_space<vmem>>, vector<128x384xbf16>
    %cst = arith.constant dense<0.000000e+00> : vector<16x384xf32>
    %3 = tpu.matmul %1, %2, %cst {dimension_numbers = #tpu.dot_dimension_numbers<[1], [0], [0], [1], [0, 0, 1, 1], [], []>} : vector<16x128xbf16>, vector<128x384xbf16>, vector<16x384xf32> -> vector<16x384xf32>
    %4 = arith.truncf %3 : vector<16x384xf32> to vector<16x384xbf16>
    %c0_3 = arith.constant 0 : index
    %c0_4 = arith.constant 0 : index
    %5 = vector.load %arg4[%c0_3, %c0_4] : memref<16x384xbf16, #tpu.memory_space<vmem>>, vector<16x384xbf16>
    tpu.vector_store %arg4[%c0_3, %c0_4], %4 {strides = array<i32>} : memref<16x384xbf16, #tpu.memory_space<vmem>>, vector<16x384xbf16>,
    return
  }
  func.func @transform_0(%arg0: i32, %arg1: i32) -> (i32, i32) {
    %c0_i32 = arith.constant 0 : i32
    %c0_i32_0 = arith.constant 0 : i32
    return %arg1, %c0_i32 : i32, i32
  }
  func.func @transform_1(%arg0: i32, %arg1: i32) -> (i32, i32) {
    %c0_i32 = arith.constant 0 : i32
    %c0_i32_0 = arith.constant 0 : i32
    %c0_i32_1 = arith.constant 0 : i32
    return %c0_i32, %c0_i32_0 : i32, i32
  }
  func.func @transform_2(%arg0: i32, %arg1: i32) -> (i32, i32) {
    %c0_i32 = arith.constant 0 : i32
    return %arg1, %arg0 : i32, i32
  }
}

</mosaic_0001>

<bundles_post_ra>
// kernel: tpu_custom_call.1
= control target key start
LH: loop header
LB: loop body
LE: loop exit
PB: predicated region body
PF: predicated region fallthrough
CT: control target
= control target key end

     0   :  { %6 = vsyncpa [#allocation3], 0  ;;  %s115_s0 = inlined_call_operand.hbm [shape: f32[8,128], index: 0, kind: input, shape index: {}]   ;;  %s116_s1 = inlined_call_operand.hbm [shape: f32[8,128], index: 1, kind: output, shape index: {}]  }
   0x1   :  { %7 = vsyncpa [#allocation4], 0  ;;  %s13_s8 = sshll.u32 %s115_s0, 4  ;;  %s97_s9 = smov [#allocation2]   ;;  %s14_s8 = int_to_ptr.hbm [resolvable:$true] %s13_s8 }
   0x2   :  { %s15_s10 = sshll.u32 %s97_s9, 4  ;;  %s16_s10 = int_to_ptr.vmem [resolvable:$true] %s15_s10 }
   0x3   :  { %18 = dma.hbm_to_vmem [thread:$0]  %s14_s8, 128, %s16_s10, [#allocation3]  }
   0x4   :  { %93 = dma.done.wait [#allocation3], 128  }
   0x5   :  { %94 = vsyncadd [#allocation3], 4294967168  ;;  %s98_s11 = smov [#allocation5]   ;;  %s33_s15 = sshll.u32 %s116_s1, 4  ;;  %v23_v0 = vld [vmem:[#allocation2] sm:$0xff]  ;;  %s34_s15 = int_to_ptr.hbm [resolvable:$true] %s33_s15 }
   0x6   :  { %s31_s12 = sshll.u32 %s98_s11, 4  ;;  %v24_v1 = vadd.f32 1.0, %v23_v0  ;;  %s32_s12 = int_to_ptr.vmem [resolvable:$true] %s31_s12 }
   0x8   :  { %25 = vst [vmem:[#allocation5] sm:$0xff] %v24_v1 }
   0x9   :  { %36 = dma.vmem_to_hbm [thread:$0]  %s32_s12, 128, %s34_s15, [#allocation4]  }
   0xa   :  { %95 = dma.done.wait [#allocation4], 128  }
   0xb   :  { %96 = vsyncadd [#allocation4], 4294967168 }
   0xc   :  { %41 = vsyncpa [#allocation3], 1 }
   0xd   :  { %42 = vsyncpa [#allocation4], 1 }

// kernel: tpu_custom_call.1
= control target key start
LH: loop header
LB: loop body
LE: loop exit
PB: predicated region body
PF: predicated region fallthrough
CT: control target
= control target key end

     0   :  { %7 = vsyncpa [#allocation3], 0  ;;  %s1066_s0 = inlined_call_operand.hbm [shape: f32[32,128], index: 0, kind: input, shape index: {}]   ;;  %s1067_s1 = inlined_call_operand.hbm [shape: bf16[128,384], index: 1, kind: input, shape index: {}]   ;;  %s1068_s2 = inlined_call_operand.hbm [shape: bf16[32,384], index: 2, kind: output, shape index: {}]  }
   0x1   :  { %9 = vsyncpa [#allocation3 + $0x1], 0 }
   0x2   :  { %10 = vsyncpa [#allocation6], 0 }
   0x3   :  { %11 = vsyncpa [#allocation4], 0 }
   0x4   :  { %13 = vsyncpa [#allocation4 + $0x1], 0  ;;  %s912_s9 = smov 0   ;;  %s914_s10 = smov 0  }
   0x5   :  { %s916_s11 = smov 0   ;;  %s918_s12 = smov 0  }
   0x6   :  { %s920_s13 = smov 0   ;;  %s922_s14 = smov 0  }
   0x7 LB: > { %s524_s15 = sadd.s32 4294967295, %s888_s14   ;;  %s525_s16 = sadd.s32 4294967294, %s888_s14   ;;  %s888_s14 = sphi %s922_s14, %s19_s14   ;;  %s884_s13 = sphi %s920_s13, %s1080_s13   ;;  %s880_s12 = sphi %s918_s12, %s1079_s12   ;;  %s876_s11 = sphi %s916_s11, %s1078_s11   ;;  %s872_s10 = sphi %s914_s10, %s1077_s10   ;;  %s868_s9 = sphi %s912_s9, %s1076_s9  }
   0x8   : > { %p51_p0 = scmp.ne.s32.totalorder %s872_s10, %s868_s9  ;;  %p946_p1 = scmp.eq.s32.totalorder %s524_s15, 0 }
   0x9   : > { %p950_p2 = scmp.eq.s32.totalorder %s524_s15, 1  ;;  %p104_p3 = scmp.eq.s32.totalorder %s525_s16, 1 }
   0xa   : > { %p956_p4 = por %p946_p1, %p51_p0  ;;  %p526_p5 = scmp.ge.s32.totalorder %s888_s14, 1 }
   0xb   : > { %p961_p6 = por %p104_p3, %p51_p0  ;;  %p111_p7 = scmp.lt.s32.totalorder %s888_s14, 3 }
   0xc   : > { %s122_s23 = sshll.u32 %s1067_s1, 4  ;;  %s890_s25 = smov [#allocation5]   ;;  %s123_s23 = int_to_ptr.hbm [resolvable:$true] %s122_s23 }
   0xd   : > { %p969_p8 = pnand %p526_p5, %p111_p7  ;;  %s124_s26 = sshll.u32 %s890_s25, 4  ;;  %s125_s26 = int_to_ptr.vmem [resolvable:$true] %s124_s26 }
   0xe   : > { %p528_p11 = scmp.ge.s32.totalorder %s888_s14, 2  ;;  %s891_s27 = smov 192  }
   0xf   : > { %p671_p9 = pneg %p969_p8  ;;  %s892_s28 = smov 12  }
  0x10   : > { %s28_s29 = sadd.s32 1, %s884_s13  ;;  %s38_s30 = sadd.s32 1, %s876_s11 }
  0x11   : > { %p672_p10 = pnand %p671_p9, %p946_p1  ;;  %p29_p12 = scmp.ge.s32.totalorder %s28_s29, 2 }
  0x12   : > { %p45_p13 = scmp.ne.s32.totalorder %s876_s11, %s872_s10  ;;  %p46_p0 = scmp.eq.s32.totalorder %s888_s14, 0 }
  0x13   : > { %674 = dma.hbm_to_vmem [thread:$0]  (!%p672_p10), %s123_s23, 3072, %s125_s26, [#allocation6], %s891_s27, %s891_s27, %s892_s28  }
  0x14   : > { %s1082_s29 = smov (%p29_p12, %s28_s29), 0  ;;  %p985_p3 = por %p46_p0, %p45_p13 }
  0x15   : > { %p991_p5 = por %p950_p2, %p45_p13  ;;  %s35_s5 = ssub.s32 %s884_s13, %s1082_s29 }
  0x16   : > { %p684_p7 = scmp.lt.s32.totalorder %s888_s14, 2  ;;  %p36_p9 = scmp.eq.s32.totalorder %s35_s5, 0 }
  0x17   : > { %s138_s6 = sand.u32 1, %s876_s11   ;;  %s636_s15 = sshll.u32 %s884_s13, 4 }
  0x18   : > { %s529_s7 = sshll.u32 %s138_s6, 4  ;;  %s147_s22 = scalar_lea.hbm %s1066_s0, %s636_s15 }
  0x19   : > { %s1000_s8 = scalar_select %p36_p9, %s876_s11, %s38_s30  }
  0x1a   : > { %s142_s23 = scalar_lea.vmem [#allocation2], %s529_s7  ;;  %s148_s18 = sshll.u32 %s147_s22, 4  ;;  %s149_s18 = int_to_ptr.hbm [resolvable:$true] %s148_s18 }
  0x1b   : > { %s150_s25 = sshll.u32 %s142_s23, 4  ;;  %p676_p2 = pnand %p684_p7, %p985_p3  ;;  %s151_s25 = int_to_ptr.vmem [resolvable:$true] %s150_s25 }
  0x1c   : > { %s139_s26 = scalar_lea.sflag [#allocation3], %s138_s6  ;;  %s893_s27 = smov 128  }
  0x1d   : > { %s894_s28 = smov 8   ;;  %162 = sbr.rel (%p969_p8) target bundleno = 219 (0xdb), region = 28 }
  0x1e   : > { %678 = dma.hbm_to_vmem [thread:$0]  (!%p676_p2), %s149_s18, 256, %s151_s25, %s139_s26, %s893_s27, %s893_s27, %s894_s28  }
  0x1f   : > { %s1011_s30 = sand.u32 (!%p969_p8), 1, %s872_s10  }
  0x20   : > { %s533_s5 = sshll.u32 (!%p969_p8), %s1011_s30, 4  ;;  %s165_s7 = scalar_lea.sflag (!%p969_p8), [#allocation3], %s1011_s30 }
  0x21   : > { %s1015_s15 = scalar_lea.vmem (!%p969_p8), [#allocation2], %s533_s5 }
  0x22   : > { %855 = dma.done.wait (%p956_p4), %s165_s7, 256  }
  0x23   : > { %857 = vsyncadd (%p956_p4), %s165_s7, 4294967040 }
  0x24   : > { %859 = dma.done.wait (%p946_p1), [#allocation6], 3072  }
  0x25   : > { %861 = vsyncadd (%p946_p1), [#allocation6], 4294964224  ;;  %v621_v0 = vld [vmem:[#allocation5 + $0xa8] sm:$0xf]  ;;  %v659_v1 = vld [vmem:[#allocation5 + $0xb0] sm:$0xf0] }
  0x26   : > { %v658_v2 = vld [vmem:[#allocation5 + $0xac] sm:$0xf]  ;;  %v622_v3 = vor.u32 %v659_v1, %v621_v0  ;;  %v623_v4 = vld [vmem:[#allocation5 + $0xb4] sm:$0xf0]  ;;  %v629_v5 = vld [vmem:[#allocation5 + $0xb0] sm:$0xf] }
  0x27   : > { %v660_v6 = vld [vmem:[#allocation5 + $0xb8] sm:$0xf0]  ;;  %v626_v7 = vor.u32 %v658_v2, %v623_v4  ;;  %v609_v9 = vld [vmem:[#allocation5 + $0x90] sm:$0xf]  ;;  %v655_v11 = vld [vmem:[#allocation5 + $0x94] sm:$0xf] }
  0x28   : > { %v630_v8 = vor.u32 %v660_v6, %v629_v5  ;;  %v656_v10 = vld [vmem:[#allocation5 + $0x98] sm:$0xf0]  ;;  %361 = vmatpush.bf16.msra.mxu0 %v622_v3  ;;  %v611_v13 = vld [vmem:[#allocation5 + $0x9c] sm:$0xf0]  ;;  %v617_v14 = vld [vmem:[#allocation5 + $0x98] sm:$0xf] }
  0x29   : > { %v610_v12 = vor.u32 %v656_v10, %v609_v9  ;;  %v657_v15 = vld [vmem:[#allocation5 + $0xa0] sm:$0xf0]  ;;  %375 = vmatpush.bf16.msra.mxu1 %v626_v7  ;;  %v614_v16 = vor.u32 %v655_v11, %v611_v13  ;;  %v597_v18 = vld [vmem:[#allocation5 + $0x78] sm:$0xf]  ;;  %v652_v20 = vld [vmem:[#allocation5 + $0x7c] sm:$0xf] }
  0x2a   : > { %389 = vmatpush.bf16.msra.mxu2 %v630_v8  ;;  %v618_v17 = vor.u32 %v657_v15, %v617_v14  ;;  %v653_v19 = vld [vmem:[#allocation5 + $0x80] sm:$0xf0]  ;;  %v599_v21 = vld [vmem:[#allocation5 + $0x84] sm:$0xf0]  ;;  %v605_v22 = vld [vmem:[#allocation5 + $0x80] sm:$0xf] }
  0x2b   : > { %v654_v23 = vld [vmem:[#allocation5 + $0x88] sm:$0xf0]  ;;  %v598_v24 = vor.u32 %v653_v19, %v597_v18  ;;  %v602_v25 = vor.u32 %v652_v20, %v599_v21  ;;  %v585_v27 = vld [vmem:[#allocation5 + $0x60] sm:$0xf]  ;;  %v649_v29 = vld [vmem:[#allocation5 + $0x64] sm:$0xf] }
  0x2c   : > { %362 = vmatpush.bf16.msra.mxu0 %v610_v12  ;;  %v606_v26 = vor.u32 %v654_v23, %v605_v22  ;;  %v650_v28 = vld [vmem:[#allocation5 + $0x68] sm:$0xf0]  ;;  %v587_v30 = vld [vmem:[#allocation5 + $0x6c] sm:$0xf0]  ;;  %v593_v31 = vld [vmem:[#allocation5 + $0x68] sm:$0xf] }
  0x2d   : > { %376 = vmatpush.bf16.msra.mxu1 %v614_v16  ;;  %v651_v32 = vld [vmem:[#allocation5 + $0x70] sm:$0xf0]  ;;  %v586_v33 = vor.u32 %v650_v28, %v585_v27  ;;  %v590_v34 = vor.u32 %v649_v29, %v587_v30  ;;  %v573_v36 = vld [vmem:[#allocation5 + $0x48] sm:$0xf]  ;;  %v646_v38 = vld [vmem:[#allocation5 + $0x4c] sm:$0xf] }
  0x2e   : > { %390 = vmatpush.bf16.msra.mxu2 %v618_v17  ;;  %v594_v35 = vor.u32 %v651_v32, %v593_v31  ;;  %v647_v37 = vld [vmem:[#allocation5 + $0x50] sm:$0xf0]  ;;  %v575_v39 = vld [vmem:[#allocation5 + $0x54] sm:$0xf0]  ;;  %v581_v40 = vld [vmem:[#allocation5 + $0x50] sm:$0xf] }
  0x2f   : > { %v648_v41 = vld [vmem:[#allocation5 + $0x58] sm:$0xf0]  ;;  %v574_v42 = vor.u32 %v647_v37, %v573_v36  ;;  %v578_v43 = vor.u32 %v646_v38, %v575_v39  ;;  %v561_v45 = vld [vmem:[#allocation5 + $0x30] sm:$0xf]  ;;  %v643_v47 = vld [vmem:[#allocation5 + $0x34] sm:$0xf] }
  0x30   : > { %363 = vmatpush.bf16.msra.mxu0 %v598_v24  ;;  %v582_v44 = vor.u32 %v648_v41, %v581_v40  ;;  %v644_v46 = vld [vmem:[#allocation5 + $0x38] sm:$0xf0]  ;;  %v563_v48 = vld [vmem:[#allocation5 + $0x3c] sm:$0xf0]  ;;  %v569_v49 = vld [vmem:[#allocation5 + $0x38] sm:$0xf] }
  0x31   : > { %377 = vmatpush.bf16.msra.mxu1 %v602_v25  ;;  %v645_v50 = vld [vmem:[#allocation5 + $0x40] sm:$0xf0]  ;;  %v562_v51 = vor.u32 %v644_v46, %v561_v45  ;;  %v566_v52 = vor.u32 %v643_v47, %v563_v48  ;;  %v549_v54 = vld [vmem:[#allocation5 + $0x18] sm:$0xf]  ;;  %v640_v56 = vld [vmem:[#allocation5 + $0x1c] sm:$0xf] }
  0x32   : > { %391 = vmatpush.bf16.msra.mxu2 %v606_v26  ;;  %v570_v53 = vor.u32 %v645_v50, %v569_v49  ;;  %v641_v55 = vld [vmem:[#allocation5 + $0x20] sm:$0xf0]  ;;  %v551_v57 = vld [vmem:[#allocation5 + $0x24] sm:$0xf0]  ;;  %v557_v58 = vld [vmem:[#allocation5 + $0x20] sm:$0xf] }
  0x33   : > { %v642_v59 = vld [vmem:[#allocation5 + $0x28] sm:$0xf0]  ;;  %v550_v60 = vor.u32 %v641_v55, %v549_v54  ;;  %v554_v61 = vor.u32 %v640_v56, %v551_v57  ;;  %v537_v63 = vld [vmem:[#allocation5] sm:$0xf]  ;;  %v637_v1 = vld [vmem:[#allocation5 + $0x4] sm:$0xf] }
  0x34   : > { %364 = vmatpush.bf16.msra.mxu0 %v586_v33  ;;  %v558_v62 = vor.u32 %v642_v59, %v557_v58  ;;  %v638_v0 = vld [vmem:[#allocation5 + $0x8] sm:$0xf0]  ;;  %v539_v2 = vld [vmem:[#allocation5 + $0xc] sm:$0xf0]  ;;  %v545_v3 = vld [vmem:[#allocation5 + $0x8] sm:$0xf] }
  0x35   : > { %378 = vmatpush.bf16.msra.mxu1 %v590_v34  ;;  %v639_v4 = vld [vmem:[#allocation5 + $0x10] sm:$0xf0]  ;;  %v538_v5 = vor.u32 %v638_v0, %v537_v63  ;;  %v199_v7 = vld [vmem:[%s1015_s15 + $0x8] sm:$0xff]  ;;  %v542_v8 = vor.u32 %v637_v1, %v539_v2  ;;  %s661_s17 = smul.u32 24, %s1011_s30  ;;  %s822_s27 = scalar_lea.hbm %s1068_s2, 48 }
  0x36   : > { %392 = vmatpush.bf16.msra.mxu2 %v594_v35  ;;  %v198_v6 = vld [vmem:[%s1015_s15] sm:$0xff]  ;;  %v546_v9 = vor.u32 %v639_v4, %v545_v3  ;;  %s662_s24 = smul.u32 24, %s880_s12  ;;  %s412_s12 = scalar_lea.sflag [#allocation4], %s1011_s30 }
  0x37   : > { %v200_v10 = vpack.c.bf16 %v199_v7, %v198_v6  ;;  %s194_s19 = scalar_lea.vmem [#allocation7], %s661_s17 }
  0x38   : > { %365 = vmatpush.bf16.msra.mxu0 %v574_v42  ;;  %s426_s16 = scalar_lea.hbm %s1068_s2, %s662_s24  ;;  %s427_s21 = sshll.u32 %s194_s19, 4  ;;  %s428_s21 = int_to_ptr.vmem [resolvable:$true] %s427_s21 }
  0x39   : > { %379 = vmatpush.bf16.msra.mxu1 %v578_v43  ;;  %s429_s22 = sshll.u32 %s426_s16, 4  ;;  %s430_s22 = int_to_ptr.hbm [resolvable:$true] %s429_s22 }
  0x3a   : > { %393 = vmatpush.bf16.msra.mxu2 %v582_v44  ;;  %s816_s23 = sshra.s32 %s430_s22, 4  ;;  %s817_s23 = int_to_ptr.hbm [resolvable:$true] %s816_s23 }
  0x3b   : > { %s818_s25 = scalar_lea.hbm %s817_s23, 24  ;;  %p823_p10 = scmp.lt.s32.totalorder %s817_s23, %s1068_s2 }
  0x3c   : > { %366 = vmatpush.bf16.msra.mxu0 %v562_v51  ;;  %p819_p1 = scmp.ne.s32.totalorder %s817_s23, %s818_s25  ;;  %p824_p12 = scmp.lt.s32.totalorder %s822_s27, %s818_s25 }
  0x3d   : > { %380 = vmatpush.bf16.msra.mxu1 %v566_v52 }
  0x3e   : > { %394 = vmatpush.bf16.msra.mxu2 %v570_v53  ;;  %p820_p4 = pnand %p819_p1, %p991_p5  ;;  %p825_p13 = por %p824_p12, %p823_p10 }
  0x40   : > { %367 = vmatpush.bf16.msra.mxu0 %v550_v60  ;;  %p821_p8 = pneg %p820_p4 }
  0x41   : > { %381 = vmatpush.bf16.msra.mxu1 %v554_v61 }
  0x42   : > { %395 = vmatpush.bf16.msra.mxu2 %v558_v62  ;;  %p826_p0 = pnand %p825_p13, %p821_p8 }
  0x44   : > { %368 = vmatpush.bf16.msra.mxu0 %v538_v5 }
  0x45   : > { %382 = vmatpush.bf16.msra.mxu1 %v542_v8 }
  0x46   : > { %396 = vmatpush.bf16.msra.mxu2 %v546_v9 }
  0x47   : > { %369 = vmatmul.bf16.vlgmr.msra.gmra.mxu0 %v200_v10 }
  0x48   : > { %383 = vmatmul.bf16.vlgmr.msra.gmra.mxu1 %v200_v10 }
  0x49   : > { %397 = vmatmul.bf16.vlgmr.msra.gmra.mxu2 %v200_v10 }
  0xc4   : > { %v370_v11 = vpop.f32.mrf.mxu0 }
  0xc5   : > { %v384_v12 = vpop.f32.mrf.mxu1 }
  0xc6   : > { %v403_v13 = vpack.c.bf16 %v384_v12, %v370_v11 }
  0xc8   : > { %407 = vst [vmem:[%s194_s19] sm:$0xff] %v403_v13 }
  0xcc   : > { %v398_v14 = vpop.f32.mrf.mxu2  ;;  %v372_v16 = vpop.f32.mrf.mxu0 }
  0xcd   : > { %v404_v15 = vpack.c.bf16 %v398_v14, %v398_v14  ;;  %v386_v17 = vpop.f32.mrf.mxu1 }
  0xce   : > { %v405_v18 = vpack.c.bf16 %v386_v17, %v372_v16 }
  0xcf   : > { %408 = vst [vmem:[%s194_s19 + $0x8] sm:$0xf] %v404_v15 }
  0xd0   : > { %409 = vst [vmem:[%s194_s19 + $0xc] sm:$0xff] %v405_v18 }
  0xd4   : > { %v400_v19 = vpop.f32.mrf.mxu2 }
  0xd5   : > { %v406_v20 = vpack.c.bf16 %v400_v19, %v400_v19 }
  0xd7   : > { %410 = vst [vmem:[%s194_s19 + $0x14] sm:$0xf] %v406_v20 }
  0xd8   : > { %829 = shalt.err (!%p826_p0)
}
  0xd9   : > { %s895_s30 = smov 192   ;;  %s896_s7 = smov 12  }
  0xda   : > { %669 = dma.vmem_to_hbm [thread:$0]  (%p991_p5), %s428_s21, 384, %s430_s22, %s412_s12, %s895_s30, %s895_s30, %s896_s7  }
  0xdb PF: > { %s444_s15 = sand.u32 1, %s868_s9   ;;  %p680_p3 = pnand %p528_p11, %p961_p6 }
  0xdc   : > { %s445_s17 = scalar_lea.sflag [#allocation4], %s444_s15 }
  0xdd   : > { %p681_p7 = pneg %p680_p3 }
  0xdf   : > { %863 = dma.done.wait (%p681_p7), %s445_s17, 384  }
  0xe0   : > { %865 = vsyncadd (%p681_p7), %s445_s17, 4294966912  ;;  %s19_s14 = sadd.s32 1, %s888_s14   ;;  %s1076_s9 = smov %s872_s10 }
  0xe1   : > { %p16_p9 = scmp.ge.s32.totalorder %s19_s14, 4   ;;  %s1077_s10 = smov %s876_s11 }
  0xe2   : > { %s1078_s11 = smov %s1000_s8  ;;  %s1079_s12 = smov %s884_s13 }
  0xe3   : > { %s1080_s13 = smov %s1082_s29  ;;  %18 = sbr.rel (!%p16_p9) target bundleno = 7 (0x7), region = 77 }
  0xe8   :  { %451 = vsyncpa [#allocation3], 1 }
  0xe9   :  { %453 = vsyncpa [#allocation3 + $0x1], 1 }
  0xea   :  { %454 = vsyncpa [#allocation6], 1 }
  0xeb   :  { %455 = vsyncpa [#allocation4], 1 }
  0xec   :  { %457 = vsyncpa [#allocation4 + $0x1], 1 }

</bundles_post_ra>
